<compile_context>
chip_gen: v6e
topology: v6e:2x2x1
jax: 0.10.0
libtpu: 0.0.40
codegen_flags: <defaults>
</compile_context>

<pallas_src>
import functools

import jax
import jax.numpy as jnp
from jax.experimental import pallas as pl
from jax.experimental.pallas import tpu as pltpu

LANE = 128     # lane width: last-dim alignment for dense vector stores / MXU columns
SUBLANE = 8    # f32 sublane alignment for the second-to-last dim


def _round_up(n, m):
    return ((n + m - 1) // m) * m


def _fused_mlp_kernel(*refs):
    """One grid step = one batch tile through the entire MLP.

    refs layout: (x_ref, w0, b0, w1, b1, ..., wL, bL, o_ref).
    Weights are bf16 full (padded) blocks resident in VMEM; biases are f32.
    The activation chain stays in vregs/VMEM. ReLU after every layer except the last.
    bf16 is used ONLY as a dot operand; accumulation / bias add / ReLU stay f32.
    """
    x_ref = refs[0]
    o_ref = refs[-1]
    wb = refs[1:-1]
    n_layers = len(wb) // 2

    h = x_ref[...].astype(jnp.float32)
    for i in range(n_layers):
        w = wb[2 * i][...]                 # (K, N_pad) bf16
        b = wb[2 * i + 1][...]             # (1, N_pad) f32, broadcasts over rows
        h = jnp.dot(h.astype(w.dtype), w, preferred_element_type=jnp.float32) + b
        if i < n_layers - 1:
            h = jnp.maximum(h, 0.0)
    o_ref[...] = h.astype(o_ref.dtype)


def init_generator_params(key, input_dim, output_dim, hidden_layers_params, dtype=jnp.float32):
    """Deterministic parameter init mirroring the nn.Linear shapes of the module.

    Weights stored as (in_features, out_features) == PyTorch weight transposed.
    """
    dims = [input_dim] + list(hidden_layers_params) + [output_dim]
    params = []
    for i in range(len(dims) - 1):
        fan_in, fan_out = dims[i], dims[i + 1]
        key, kw, kb = jax.random.split(key, 3)
        bound = 1.0 / jnp.sqrt(fan_in)
        w = jax.random.uniform(kw, (fan_in, fan_out), dtype, -bound, bound)
        b = jax.random.uniform(kb, (fan_out,), dtype, -bound, bound)
        params.append((w, b))
    return params


def pad_generator_params(params, n_align=LANE, weight_dtype=jnp.bfloat16):
    """Prep-time padding/casting (done ONCE, outside the forward path).

    * N (output features) is zero-padded to a multiple of `n_align` (128 default;
      use 256 on v6e/v7x if hidden widths are tunable).
    * K (input features) is NOT padded to 128: layer 0 keeps the raw input_dim and
      layer i>0 matches the previous layer's padded N exactly.
    * Weights are stored in bf16 (MXU operands); biases stay f32 (bias add in f32).
    Zero padding keeps padded activation columns exactly 0 through ReLU.
    """
    padded = []
    k_prev = params[0][0].shape[0]          # input_dim, unpadded
    for w, b in params:
        K, N = w.shape
        Kp = k_prev                         # == previous (padded) activation width
        Np = _round_up(N, n_align)
        wp = jnp.zeros((Kp, Np), weight_dtype).at[:K, :N].set(w.astype(weight_dtype))
        bp = jnp.zeros((1, Np), jnp.float32).at[0, :N].set(b.astype(jnp.float32))
        padded.append((wp, bp))
        k_prev = Np
    return padded


@functools.partial(jax.jit,
                   static_argnames=("output_dim", "tile_m", "single_buffer_weights"))
def generator_forward(padded_params, x, *, output_dim, tile_m=256,
                      single_buffer_weights=True):
    """Fused forward pass: ReLU after every layer except the last (PyTorch semantics).

    padded_params: output of pad_generator_params.
    x: (batch, input_dim) f32. Returns (batch, output_dim) f32.
    """
    M, K = x.shape
    K0 = padded_params[0][0].shape[0]
    Np_last = padded_params[-1][0].shape[1]
    assert K == K0, (K, K0)

    # Batch tile: multiple of 8, <= tile_m. Pad the batch ONLY if the last tile is
    # ragged (avoids a full HBM rewrite of x for the common divisible case).
    tm = min(tile_m, _round_up(M, SUBLANE))
    grid_m = pl.cdiv(M, tm)
    Mp = grid_m * tm
    xp = x if Mp == M else jnp.pad(x, ((0, Mp - M), (0, 0)))

    # x tiled over the batch grid (last dim = full array dim -> legal, no K pad);
    # every (w, b) is a full resident block with a constant index_map.
    def _param_spec(shape):
        if single_buffer_weights:
            # Grid-invariant block: single buffer halves its VMEM footprint and
            # drops redundant DMA bookkeeping.
            return pl.BlockSpec(shape, lambda i: (0, 0), pipeline_mode=pl.Buffered(1))
        return pl.BlockSpec(shape, lambda i: (0, 0))

    in_specs = [pl.BlockSpec((tm, K), lambda i: (i, 0))]
    flat_params = []
    param_bytes = 0
    flops = 0
    for w, b in padded_params:
        in_specs.append(_param_spec(w.shape))
        in_specs.append(_param_spec(b.shape))
        flat_params += [w, b]
        param_bytes += w.size * w.dtype.itemsize + b.size * b.dtype.itemsize
        flops += 2 * Mp * w.shape[0] * w.shape[1]

    x_tile_bytes = tm * K * x.dtype.itemsize
    out_tile_bytes = tm * Np_last * x.dtype.itemsize
    bytes_accessed = (Mp * K * x.dtype.itemsize          # x stream
                      + param_bytes                       # resident params
                      + Mp * Np_last * x.dtype.itemsize)  # output stream

    # VMEM budget: params (single-buffered) + double-buffered x/out tiles + headroom.
    # Clamp to 48 MiB so it stays under v7x's 64 MiB physical VMEM.
    vmem_needed = param_bytes + 2 * (x_tile_bytes + out_tile_bytes)
    vmem_limit = int(min(max(2 * vmem_needed, 32 << 20), 48 << 20))

    out_padded = pl.pallas_call(
        _fused_mlp_kernel,
        out_shape=jax.ShapeDtypeStruct((Mp, Np_last), x.dtype),
        grid=(grid_m,),
        in_specs=in_specs,
        out_specs=pl.BlockSpec((tm, Np_last), lambda i: (i, 0)),
        compiler_params=pltpu.CompilerParams(
            # Batch tiles are independent -> shard across both TCs on v7x.
            dimension_semantics=("parallel",),
            vmem_limit_bytes=vmem_limit,
        ),
        cost_estimate=pl.CostEstimate(flops=flops, transcendentals=0,
                                      bytes_accessed=bytes_accessed),
    )(xp, *flat_params)

    # Slice away batch/feature padding (padded feature columns are exactly zero).
    return out_padded[:M, :output_dim]


def generator_forward_ref(params, x):
    """Pure-JAX f32 reference (unpadded params) for validation."""
    n = len(params)
    h = x
    for i, (w, b) in enumerate(params):
        h = h @ w + b
        if i < n - 1:
            h = jnp.maximum(h, 0.0)
    return h


if __name__ == "__main__":
    key = jax.random.PRNGKey(0)
    k_params, k_x = jax.random.split(key)

    batch = 8
    input_dim = 32
    hidden_layers_params = [64, 64]
    output_dim = 16

    params = init_generator_params(k_params, input_dim, output_dim, hidden_layers_params)
    padded_params = pad_generator_params(params)   # n_align=256 recommended on v6e/v7x
    x = jax.random.normal(k_x, (batch, input_dim), jnp.float32)

    def _run(single_buffer_weights):
        o = generator_forward(padded_params, x, output_dim=output_dim,
                              single_buffer_weights=single_buffer_weights)
        return jax.block_until_ready(o)

    try:
        out = _run(True)
    except Exception:
        # Older jax: pipeline_mode=pl.Buffered(1) unsupported -> default buffering.
        out = _run(False)

    ref = generator_forward_ref(params, x)
    assert out.shape == (batch, output_dim), out.shape
    # bf16 MXU operands (f32 accumulation) -> looser tolerance than pure f32.
    assert jnp.allclose(out, ref, atol=5e-2, rtol=5e-2), "mismatch vs reference"

    print("KERNEL_OK")
</pallas_src>

<mosaic_0001>
module attributes {stable_mosaic.version = 11 : i64} {
  func.func @_fused_mlp_kernel(%arg0: i32, %arg1: memref<8x32xf32, #tpu.memory_space<vmem>>, %arg2: memref<32x128xbf16, #tpu.memory_space<vmem>>, %arg3: memref<1x128xf32, #tpu.memory_space<vmem>>, %arg4: memref<128x128xbf16, #tpu.memory_space<vmem>>, %arg5: memref<1x128xf32, #tpu.memory_space<vmem>>, %arg6: memref<128x128xbf16, #tpu.memory_space<vmem>>, %arg7: memref<1x128xf32, #tpu.memory_space<vmem>>, %arg8: memref<8x128xf32, #tpu.memory_space<vmem>>) attributes {dimension_semantics = [#tpu.dimension_semantics<parallel>], iteration_bounds = array<i64: 1>, scalar_prefetch = 0 : i64, scratch_operands = 0 : i64, tpu.core_type = #tpu.core_type<tc>, window_params = [{transform_indices = @transform_0, window_bounds = array<i64: 8, 32>}, {pipeline_mode = #tpu.pipeline_mode<synchronous>, transform_indices = @transform_1, window_bounds = array<i64: 32, 128>}, {pipeline_mode = #tpu.pipeline_mode<synchronous>, transform_indices = @transform_2, window_bounds = array<i64: 1, 128>}, {pipeline_mode = #tpu.pipeline_mode<synchronous>, transform_indices = @transform_3, window_bounds = array<i64: 128, 128>}, {pipeline_mode = #tpu.pipeline_mode<synchronous>, transform_indices = @transform_4, window_bounds = array<i64: 1, 128>}, {pipeline_mode = #tpu.pipeline_mode<synchronous>, transform_indices = @transform_5, window_bounds = array<i64: 128, 128>}, {pipeline_mode = #tpu.pipeline_mode<synchronous>, transform_indices = @transform_6, window_bounds = array<i64: 1, 128>}, {transform_indices = @transform_7, window_bounds = array<i64: 8, 128>}]} {
    %c0 = arith.constant 0 : index
    %c0_0 = arith.constant 0 : index
    %0 = vector.load %arg1[%c0, %c0_0] : memref<8x32xf32, #tpu.memory_space<vmem>>, vector<8x32xf32>
    %c0_1 = arith.constant 0 : index
    %c0_2 = arith.constant 0 : index
    %1 = vector.load %arg2[%c0_1, %c0_2] : memref<32x128xbf16, #tpu.memory_space<vmem>>, vector<32x128xbf16>
    %c0_3 = arith.constant 0 : index
    %c0_4 = arith.constant 0 : index
    %2 = vector.load %arg3[%c0_3, %c0_4] : memref<1x128xf32, #tpu.memory_space<vmem>>, vector<1x128xf32>
    %3 = arith.truncf %0 : vector<8x32xf32> to vector<8x32xbf16>
    %cst = arith.constant dense<0.000000e+00> : vector<8x128xf32>
    %4 = tpu.matmul %3, %1, %cst {dimension_numbers = #tpu.dot_dimension_numbers<[1], [0], [0], [1], [0, 0, 1, 1], [], []>} : vector<8x32xbf16>, vector<32x128xbf16>, vector<8x128xf32> -> vector<8x128xf32>
    %5 = vector.broadcast %2 : vector<1x128xf32> to vector<8x128xf32>
    %6 = arith.addf %4, %5 : vector<8x128xf32>
    %cst_5 = arith.constant 0.000000e+00 : f32
    %7 = vector.broadcast %cst_5 : f32 to vector<8x128xf32>
    %8 = arith.maximumf %6, %7 : vector<8x128xf32>
    %c0_6 = arith.constant 0 : index
    %c0_7 = arith.constant 0 : index
    %9 = vector.load %arg4[%c0_6, %c0_7] : memref<128x128xbf16, #tpu.memory_space<vmem>>, vector<128x128xbf16>
    %c0_8 = arith.constant 0 : index
    %c0_9 = arith.constant 0 : index
    %10 = vector.load %arg5[%c0_8, %c0_9] : memref<1x128xf32, #tpu.memory_space<vmem>>, vector<1x128xf32>
    %11 = arith.truncf %8 : vector<8x128xf32> to vector<8x128xbf16>
    %cst_10 = arith.constant dense<0.000000e+00> : vector<8x128xf32>
    %12 = tpu.matmul %11, %9, %cst_10 {dimension_numbers = #tpu.dot_dimension_numbers<[1], [0], [0], [1], [0, 0, 1, 1], [], []>} : vector<8x128xbf16>, vector<128x128xbf16>, vector<8x128xf32> -> vector<8x128xf32>
    %13 = vector.broadcast %10 : vector<1x128xf32> to vector<8x128xf32>
    %14 = arith.addf %12, %13 : vector<8x128xf32>
    %cst_11 = arith.constant 0.000000e+00 : f32
    %15 = vector.broadcast %cst_11 : f32 to vector<8x128xf32>
    %16 = arith.maximumf %14, %15 : vector<8x128xf32>
    %c0_12 = arith.constant 0 : index
    %c0_13 = arith.constant 0 : index
    %17 = vector.load %arg6[%c0_12, %c0_13] : memref<128x128xbf16, #tpu.memory_space<vmem>>, vector<128x128xbf16>
    %c0_14 = arith.constant 0 : index
    %c0_15 = arith.constant 0 : index
    %18 = vector.load %arg7[%c0_14, %c0_15] : memref<1x128xf32, #tpu.memory_space<vmem>>, vector<1x128xf32>
    %19 = arith.truncf %16 : vector<8x128xf32> to vector<8x128xbf16>
    %cst_16 = arith.constant dense<0.000000e+00> : vector<8x128xf32>
    %20 = tpu.matmul %19, %17, %cst_16 {dimension_numbers = #tpu.dot_dimension_numbers<[1], [0], [0], [1], [0, 0, 1, 1], [], []>} : vector<8x128xbf16>, vector<128x128xbf16>, vector<8x128xf32> -> vector<8x128xf32>
    %21 = vector.broadcast %18 : vector<1x128xf32> to vector<8x128xf32>
    %22 = arith.addf %20, %21 : vector<8x128xf32>
    %c0_17 = arith.constant 0 : index
    %c0_18 = arith.constant 0 : index
    %23 = vector.load %arg8[%c0_17, %c0_18] : memref<8x128xf32, #tpu.memory_space<vmem>>, vector<8x128xf32>
    tpu.vector_store %arg8[%c0_17, %c0_18], %22 {strides = array<i32>} : memref<8x128xf32, #tpu.memory_space<vmem>>, vector<8x128xf32>,
    return
  }
  func.func @transform_0(%arg0: i32) -> (i32, i32) {
    %c0_i32 = arith.constant 0 : i32
    %c0_i32_0 = arith.constant 0 : i32
    return %arg0, %c0_i32 : i32, i32
  }
  func.func @transform_1(%arg0: i32) -> (i32, i32) {
    %c0_i32 = arith.constant 0 : i32
    %c0_i32_0 = arith.constant 0 : i32
    %c0_i32_1 = arith.constant 0 : i32
    return %c0_i32, %c0_i32_0 : i32, i32
  }
  func.func @transform_2(%arg0: i32) -> (i32, i32) {
    %c0_i32 = arith.constant 0 : i32
    %c0_i32_0 = arith.constant 0 : i32
    %c0_i32_1 = arith.constant 0 : i32
    return %c0_i32, %c0_i32_0 : i32, i32
  }
  func.func @transform_3(%arg0: i32) -> (i32, i32) {
    %c0_i32 = arith.constant 0 : i32
    %c0_i32_0 = arith.constant 0 : i32
    %c0_i32_1 = arith.constant 0 : i32
    return %c0_i32, %c0_i32_0 : i32, i32
  }
  func.func @transform_4(%arg0: i32) -> (i32, i32) {
    %c0_i32 = arith.constant 0 : i32
    %c0_i32_0 = arith.constant 0 : i32
    %c0_i32_1 = arith.constant 0 : i32
    return %c0_i32, %c0_i32_0 : i32, i32
  }
  func.func @transform_5(%arg0: i32) -> (i32, i32) {
    %c0_i32 = arith.constant 0 : i32
    %c0_i32_0 = arith.constant 0 : i32
    %c0_i32_1 = arith.constant 0 : i32
    return %c0_i32, %c0_i32_0 : i32, i32
  }
  func.func @transform_6(%arg0: i32) -> (i32, i32) {
    %c0_i32 = arith.constant 0 : i32
    %c0_i32_0 = arith.constant 0 : i32
    %c0_i32_1 = arith.constant 0 : i32
    return %c0_i32, %c0_i32_0 : i32, i32
  }
  func.func @transform_7(%arg0: i32) -> (i32, i32) {
    %c0_i32 = arith.constant 0 : i32
    %c0_i32_0 = arith.constant 0 : i32
    return %arg0, %c0_i32 : i32, i32
  }
}

module attributes {stable_mosaic.version = 11 : i64} {
  func.func @_fused_mlp_kernel(%arg0: i32, %arg1: memref<8x32xf32, #tpu.memory_space<vmem>>, %arg2: memref<32x128xbf16, #tpu.memory_space<vmem>>, %arg3: memref<1x128xf32, #tpu.memory_space<vmem>>, %arg4: memref<128x128xbf16, #tpu.memory_space<vmem>>, %arg5: memref<1x128xf32, #tpu.memory_space<vmem>>, %arg6: memref<128x128xbf16, #tpu.memory_space<vmem>>, %arg7: memref<1x128xf32, #tpu.memory_space<vmem>>, %arg8: memref<8x128xf32, #tpu.memory_space<vmem>>) attributes {dimension_semantics = [#tpu.dimension_semantics<parallel>], iteration_bounds = array<i64: 1>, scalar_prefetch = 0 : i64, scratch_operands = 0 : i64, tpu.core_type = #tpu.core_type<tc>, window_params = [{transform_indices = @transform_0, window_bounds = array<i64: 8, 32>}, {pipeline_mode = #tpu.pipeline_mode<synchronous>, transform_indices = @transform_1, window_bounds = array<i64: 32, 128>}, {pipeline_mode = #tpu.pipeline_mode<synchronous>, transform_indices = @transform_2, window_bounds = array<i64: 1, 128>}, {pipeline_mode = #tpu.pipeline_mode<synchronous>, transform_indices = @transform_3, window_bounds = array<i64: 128, 128>}, {pipeline_mode = #tpu.pipeline_mode<synchronous>, transform_indices = @transform_4, window_bounds = array<i64: 1, 128>}, {pipeline_mode = #tpu.pipeline_mode<synchronous>, transform_indices = @transform_5, window_bounds = array<i64: 128, 128>}, {pipeline_mode = #tpu.pipeline_mode<synchronous>, transform_indices = @transform_6, window_bounds = array<i64: 1, 128>}, {transform_indices = @transform_7, window_bounds = array<i64: 8, 128>}]} {
    %c0 = arith.constant 0 : index
    %c0_0 = arith.constant 0 : index
    %0 = vector.load %arg1[%c0, %c0_0] : memref<8x32xf32, #tpu.memory_space<vmem>>, vector<8x32xf32>
    %c0_1 = arith.constant 0 : index
    %c0_2 = arith.constant 0 : index
    %1 = vector.load %arg2[%c0_1, %c0_2] : memref<32x128xbf16, #tpu.memory_space<vmem>>, vector<32x128xbf16>
    %c0_3 = arith.constant 0 : index
    %c0_4 = arith.constant 0 : index
    %2 = vector.load %arg3[%c0_3, %c0_4] : memref<1x128xf32, #tpu.memory_space<vmem>>, vector<1x128xf32>
    %3 = arith.truncf %0 : vector<8x32xf32> to vector<8x32xbf16>
    %cst = arith.constant dense<0.000000e+00> : vector<8x128xf32>
    %4 = tpu.matmul %3, %1, %cst {dimension_numbers = #tpu.dot_dimension_numbers<[1], [0], [0], [1], [0, 0, 1, 1], [], []>} : vector<8x32xbf16>, vector<32x128xbf16>, vector<8x128xf32> -> vector<8x128xf32>
    %5 = vector.broadcast %2 : vector<1x128xf32> to vector<8x128xf32>
    %6 = arith.addf %4, %5 : vector<8x128xf32>
    %cst_5 = arith.constant 0.000000e+00 : f32
    %7 = vector.broadcast %cst_5 : f32 to vector<8x128xf32>
    %8 = arith.maximumf %6, %7 : vector<8x128xf32>
    %c0_6 = arith.constant 0 : index
    %c0_7 = arith.constant 0 : index
    %9 = vector.load %arg4[%c0_6, %c0_7] : memref<128x128xbf16, #tpu.memory_space<vmem>>, vector<128x128xbf16>
    %c0_8 = arith.constant 0 : index
    %c0_9 = arith.constant 0 : index
    %10 = vector.load %arg5[%c0_8, %c0_9] : memref<1x128xf32, #tpu.memory_space<vmem>>, vector<1x128xf32>
    %11 = arith.truncf %8 : vector<8x128xf32> to vector<8x128xbf16>
    %cst_10 = arith.constant dense<0.000000e+00> : vector<8x128xf32>
    %12 = tpu.matmul %11, %9, %cst_10 {dimension_numbers = #tpu.dot_dimension_numbers<[1], [0], [0], [1], [0, 0, 1, 1], [], []>} : vector<8x128xbf16>, vector<128x128xbf16>, vector<8x128xf32> -> vector<8x128xf32>
    %13 = vector.broadcast %10 : vector<1x128xf32> to vector<8x128xf32>
    %14 = arith.addf %12, %13 : vector<8x128xf32>
    %cst_11 = arith.constant 0.000000e+00 : f32
    %15 = vector.broadcast %cst_11 : f32 to vector<8x128xf32>
    %16 = arith.maximumf %14, %15 : vector<8x128xf32>
    %c0_12 = arith.constant 0 : index
    %c0_13 = arith.constant 0 : index
    %17 = vector.load %arg6[%c0_12, %c0_13] : memref<128x128xbf16, #tpu.memory_space<vmem>>, vector<128x128xbf16>
    %c0_14 = arith.constant 0 : index
    %c0_15 = arith.constant 0 : index
    %18 = vector.load %arg7[%c0_14, %c0_15] : memref<1x128xf32, #tpu.memory_space<vmem>>, vector<1x128xf32>
    %19 = arith.truncf %16 : vector<8x128xf32> to vector<8x128xbf16>
    %cst_16 = arith.constant dense<0.000000e+00> : vector<8x128xf32>
    %20 = tpu.matmul %19, %17, %cst_16 {dimension_numbers = #tpu.dot_dimension_numbers<[1], [0], [0], [1], [0, 0, 1, 1], [], []>} : vector<8x128xbf16>, vector<128x128xbf16>, vector<8x128xf32> -> vector<8x128xf32>
    %21 = vector.broadcast %18 : vector<1x128xf32> to vector<8x128xf32>
    %22 = arith.addf %20, %21 : vector<8x128xf32>
    %c0_17 = arith.constant 0 : index
    %c0_18 = arith.constant 0 : index
    %23 = vector.load %arg8[%c0_17, %c0_18] : memref<8x128xf32, #tpu.memory_space<vmem>>, vector<8x128xf32>
    tpu.vector_store %arg8[%c0_17, %c0_18], %22 {strides = array<i32>} : memref<8x128xf32, #tpu.memory_space<vmem>>, vector<8x128xf32>,
    return
  }
  func.func @transform_0(%arg0: i32) -> (i32, i32) {
    %c0_i32 = arith.constant 0 : i32
    %c0_i32_0 = arith.constant 0 : i32
    return %arg0, %c0_i32 : i32, i32
  }
  func.func @transform_1(%arg0: i32) -> (i32, i32) {
    %c0_i32 = arith.constant 0 : i32
    %c0_i32_0 = arith.constant 0 : i32
    %c0_i32_1 = arith.constant 0 : i32
    return %c0_i32, %c0_i32_0 : i32, i32
  }
  func.func @transform_2(%arg0: i32) -> (i32, i32) {
    %c0_i32 = arith.constant 0 : i32
    %c0_i32_0 = arith.constant 0 : i32
    %c0_i32_1 = arith.constant 0 : i32
    return %c0_i32, %c0_i32_0 : i32, i32
  }
  func.func @transform_3(%arg0: i32) -> (i32, i32) {
    %c0_i32 = arith.constant 0 : i32
    %c0_i32_0 = arith.constant 0 : i32
    %c0_i32_1 = arith.constant 0 : i32
    return %c0_i32, %c0_i32_0 : i32, i32
  }
  func.func @transform_4(%arg0: i32) -> (i32, i32) {
    %c0_i32 = arith.constant 0 : i32
    %c0_i32_0 = arith.constant 0 : i32
    %c0_i32_1 = arith.constant 0 : i32
    return %c0_i32, %c0_i32_0 : i32, i32
  }
  func.func @transform_5(%arg0: i32) -> (i32, i32) {
    %c0_i32 = arith.constant 0 : i32
    %c0_i32_0 = arith.constant 0 : i32
    %c0_i32_1 = arith.constant 0 : i32
    return %c0_i32, %c0_i32_0 : i32, i32
  }
  func.func @transform_6(%arg0: i32) -> (i32, i32) {
    %c0_i32 = arith.constant 0 : i32
    %c0_i32_0 = arith.constant 0 : i32
    %c0_i32_1 = arith.constant 0 : i32
    return %c0_i32, %c0_i32_0 : i32, i32
  }
  func.func @transform_7(%arg0: i32) -> (i32, i32) {
    %c0_i32 = arith.constant 0 : i32
    %c0_i32_0 = arith.constant 0 : i32
    return %arg0, %c0_i32 : i32, i32
  }
}

</mosaic_0001>

<bundles_post_ra>
// kernel: generator_forward.1
= control target key start
LH: loop header
LB: loop body
LE: loop exit
PB: predicated region body
PF: predicated region fallthrough
CT: control target
= control target key end

     0   :  { %12 = vsyncpa [#allocation3], 0  ;;  %s717_s0 = inlined_call_operand.vmem [shape: f32[8,32], index: 0, kind: input, shape index: {}]   ;;  %s718_s1 = inlined_call_operand.hbm [shape: bf16[32,128], index: 1, kind: input, shape index: {}]   ;;  %s719_s2 = inlined_call_operand.vmem [shape: f32[1,128], index: 2, kind: input, shape index: {}]   ;;  %s720_s3 = inlined_call_operand.hbm [shape: bf16[128,128], index: 3, kind: input, shape index: {}]   ;;  %s721_s4 = inlined_call_operand.vmem [shape: f32[1,128], index: 4, kind: input, shape index: {}]   ;;  %s722_s5 = inlined_call_operand.hbm [shape: bf16[128,128], index: 5, kind: input, shape index: {}]   ;;  %s723_s6 = inlined_call_operand.hbm [shape: f32[1,128], index: 6, kind: input, shape index: {}]   ;;  %s724_s7 = inlined_call_operand.hbm [shape: f32[8,128], index: 7, kind: output, shape index: {}]  }
   0x1   :  { %13 = vsyncpa [#allocation6], 0 }
   0x2   :  { %14 = vsyncpa [#allocation9], 0 }
   0x3   :  { %15 = vsyncpa [#allocation4], 0  ;;  %s620_s24 = smov [#allocation5]   ;;  %s621_s26 = smov [#allocation2]  }
   0x4   :  { %s37_s25 = sshll.u32 %s620_s24, 4  ;;  %s23_s27 = sshll.u32 %s621_s26, 4  ;;  %s38_s25 = int_to_ptr.vmem [resolvable:$true] %s37_s25  ;;  %s24_s27 = int_to_ptr.vmem [resolvable:$true] %s23_s27 }
   0x5   :  { %s520_s28 = scalar_lea.vmem %s38_s25, 1024  ;;  %p525_p1 = scmp.lt.s32.totalorder %s38_s25, %s38_s25 }
   0x6   :  { %p521_p0 = scmp.ne.s32.totalorder %s38_s25, %s520_s28  ;;  %p526_p2 = scmp.lt.s32.totalorder %s520_s28, %s520_s28 }
   0x8   :  { %p527_p3 = por %p526_p2, %p525_p1 }
   0xa   :  { %p528_p4 = pnand %p527_p3, %p521_p0 }
   0xc   :  { %531 = shalt.err (!%p528_p4)
}
   0xd   :  { %s622_s29 = smov 64   ;;  %s623_s30 = smov 4  }
   0xe   :  { %43 = dma.hbm_to_vmem [thread:$0]  %s720_s3, 1024, %s38_s25, [#allocation6], %s622_s29, %s622_s29, %s623_s30  }
   0xf   :  { %s540_s10 = scalar_lea.vmem %s24_s27, 256  ;;  %p545_p6 = scmp.lt.s32.totalorder %s24_s27, %s24_s27 }
  0x10   :  { %p541_p5 = scmp.ne.s32.totalorder %s24_s27, %s540_s10  ;;  %p546_p7 = scmp.lt.s32.totalorder %s540_s10, %s540_s10 }
  0x12   :  { %p547_p8 = por %p546_p7, %p545_p6 }
  0x14   :  { %p548_p9 = pnand %p547_p8, %p541_p5 }
  0x16   :  { %551 = shalt.err (!%p548_p9)
}
  0x17   :  { %29 = dma.hbm_to_vmem [thread:$0]  %s718_s1, 256, %s24_s27, [#allocation3], %s622_s29, %s622_s29, %s623_s30  }
  0x18   :  { %s624_s13 = smov [#allocation7]   ;;  %s625_s15 = smov [#allocation8]  }
  0x19   :  { %s51_s14 = sshll.u32 %s624_s13, 4  ;;  %s64_s16 = sshll.u32 %s625_s15, 4  ;;  %s52_s14 = int_to_ptr.vmem [resolvable:$true] %s51_s14  ;;  %s65_s16 = int_to_ptr.vmem [resolvable:$true] %s64_s16 }
  0x1a   :  { %s560_s17 = scalar_lea.vmem %s52_s14, 1024  ;;  %p565_p11 = scmp.lt.s32.totalorder %s52_s14, %s52_s14 }
  0x1b   :  { %p561_p10 = scmp.ne.s32.totalorder %s52_s14, %s560_s17  ;;  %p566_p12 = scmp.lt.s32.totalorder %s560_s17, %s560_s17 }
  0x1d   :  { %p567_p13 = por %p566_p12, %p565_p11 }
  0x1f   :  { %p568_p0 = pnand %p567_p13, %p561_p10 }
  0x21   :  { %571 = shalt.err (!%p568_p0)
}
  0x22   :  { %57 = dma.hbm_to_vmem [thread:$0]  %s722_s5, 1024, %s52_s14, [#allocation6], %s622_s29, %s622_s29, %s623_s30  }
  0x23   :  { %s580_s19 = scalar_lea.vmem %s65_s16, 16  ;;  %s584_s1 = scalar_lea.vmem %s65_s16, 32 }
  0x24   :  { %p581_p1 = scmp.ne.s32.totalorder %s65_s16, %s580_s19  ;;  %p585_p2 = scmp.lt.s32.totalorder %s65_s16, %s65_s16 }
  0x25   :  { %p586_p3 = scmp.lt.s32.totalorder %s584_s1, %s580_s19 }
  0x27   :  { %p587_p4 = por %p586_p3, %p585_p2 }
  0x29   :  { %p588_p5 = pnand %p587_p4, %p581_p1 }
  0x2b   :  { %591 = shalt.err (!%p588_p5)
}
  0x2c   :  { %67 = dma.hbm_to_vmem [thread:$0]  %s723_s6, 16, %s65_s16, [#allocation9]  }
  0x2d   :  { %612 = dma.done.wait [#allocation3], 256  }
  0x2e   :  { %613 = vsyncadd [#allocation3], 4294967040 }
  0x2f   :  { %614 = dma.done.wait [#allocation6], 2048  }
  0x30   :  { %615 = vsyncadd [#allocation6], 4294965248 }
  0x31   :  { %616 = dma.done.wait [#allocation9], 16  }
  0x32   :  { %617 = vsyncadd [#allocation9], 4294967280  ;;  %v626_v0 = vmov 0.0   ;;  %vm627_vm0 = vmmov 0   ;;  %v494_v1 = vld [vmem:[#allocation2 + $0x8] sm:$0xff]   ;;  %v495_v2 = vld [vmem:[#allocation2] sm:$0xff]  }
  0x33   :  { %437 = vmatprep.subr.bf16.mxu0 %v626_v0  ;;  %441 = vmatprep.mubr.msk.bf16.mxu0 %vm627_vm0, %v626_v0  ;;  %v81_v3 = vld [vmem:[%s717_s0] sm:$0xff]  ;;  %v496_v4 = vld [vmem:[#allocation5 + $0x38] sm:$0xff]   ;;  %vm106_vm1 = vcmask 261120   ;;  %v498_v7 = vld [vmem:[#allocation5 + $0x28] sm:$0xff]  }
  0x34   :  { %445 = vmatprep.subr.bf16.mxu1 %v626_v0  ;;  %461 = vmatprep.mubr.msk.bf16.mxu1 %vm627_vm0, %v626_v0  ;;  %v87_v5 = vpack.c.bf16 %v81_v3, %v81_v3  ;;  %v497_v6 = vld [vmem:[#allocation5 + $0x30] sm:$0xff]   ;;  %v499_v8 = vld [vmem:[#allocation5 + $0x20] sm:$0xff]   ;;  %v500_v9 = vld [vmem:[#allocation5 + $0x18] sm:$0xff]  }
  0x35   :  { %438 = vmatpush3.bf16.msra.mxu0 %v494_v1  ;;  %446 = vmatpush3.bf16.msra.mxu1 %v496_v4  ;;  %v501_v10 = vld [vmem:[#allocation5 + $0x10] sm:$0xff]   ;;  %v502_v11 = vld [vmem:[#allocation5 + $0x8] sm:$0xff]   ;;  %v503_v12 = vld [vmem:[#allocation5] sm:$0xff]  }
  0x36   :  { %439 = vmatprep.subr.bf16.mxu0 %v626_v0  ;;  %447 = vmatprep.subr.bf16.mxu1 %v626_v0  ;;  %v504_v13 = vld [vmem:[#allocation7 + $0x38] sm:$0xff]   ;;  %v505_v14 = vld [vmem:[#allocation7 + $0x30] sm:$0xff]   ;;  %v506_v15 = vld [vmem:[#allocation7 + $0x28] sm:$0xff]  }
  0x37   :  { %v507_v16 = vld [vmem:[#allocation7 + $0x20] sm:$0xff]   ;;  %v508_v17 = vld [vmem:[#allocation7 + $0x18] sm:$0xff]   ;;  %v509_v18 = vld [vmem:[#allocation7 + $0x10] sm:$0xff]  }
  0x38   :  { %v394_v19 = vld [vmem:[%s719_s2] ss:$0 sm:$0xff]  ;;  %v510_v27 = vld [vmem:[#allocation7 + $0x8] sm:$0xff]   ;;  %v511_v28 = vld [vmem:[#allocation7] sm:$0xff]   ;;  %s628_s2 = smov [#allocation10]  }
  0x39   :  { %440 = vmatpush3.bf16.msra.mxu0 %v495_v2  ;;  %448 = vmatpush3.bf16.msra.mxu1 %v497_v6  ;;  %v398_v29 = vld [vmem:[%s721_s4] ss:$0 sm:$0xff]  ;;  %v407_v37 = vld [vmem:[#allocation8] ss:$0 sm:$0xff]  ;;  %s383_s25 = sshll.u32 %s628_s2, 4  ;;  %s384_s25 = int_to_ptr.vmem [resolvable:$true] %s383_s25 }
  0x3a   :  { %465 = vmatprep.subr.bf16.mxu0 %v626_v0  ;;  %449 = vmatprep.subr.bf16.mxu1 %v626_v0  ;;  %s592_s26 = scalar_lea.vmem %s384_s25, 128  ;;  %p597_p7 = scmp.lt.s32.totalorder %s384_s25, %s384_s25 }
  0x3b   :  { %p593_p6 = scmp.ne.s32.totalorder %s384_s25, %s592_s26  ;;  %p598_p8 = scmp.lt.s32.totalorder %s592_s26, %s592_s26 }
  0x3c   :  { %442 = vmatmul.mubr.msk.bf16.vlgmr.msra.gmra.mxu0 %vm106_vm1, %v87_v5 }
  0x3d   :  { %481 = vmatprep.mubr.msk.bf16.mxu0 %vm627_vm0, %v626_v0  ;;  %450 = vmatpush3.bf16.msra.mxu1 %v498_v7  ;;  %p599_p9 = por %p598_p8, %p597_p7 }
  0x3e   :  { %451 = vmatprep.subr.bf16.mxu1 %v626_v0  ;;  %466 = vmatpush3.bf16.msra.mxu0 %v504_v13 }
  0x3f   :  { %467 = vmatprep.subr.bf16.mxu0 %v626_v0  ;;  %p600_p10 = pnand %p599_p9, %p593_p6 }
  0x41   :  { %452 = vmatpush3.bf16.msra.mxu1 %v499_v8 }
  0x42   :  { %453 = vmatprep.subr.bf16.mxu1 %v626_v0  ;;  %468 = vmatpush3.bf16.msra.mxu0 %v505_v14 }
  0x43   :  { %469 = vmatprep.subr.bf16.mxu0 %v626_v0 }
  0x45   :  { %454 = vmatpush3.bf16.msra.mxu1 %v500_v9 }
  0x46   :  { %455 = vmatprep.subr.bf16.mxu1 %v626_v0  ;;  %470 = vmatpush3.bf16.msra.mxu0 %v506_v15 }
  0x47   :  { %471 = vmatprep.subr.bf16.mxu0 %v626_v0 }
  0x49   :  { %456 = vmatpush3.bf16.msra.mxu1 %v501_v10 }
  0x4a   :  { %457 = vmatprep.subr.bf16.mxu1 %v626_v0  ;;  %472 = vmatpush3.bf16.msra.mxu0 %v507_v16 }
  0x4b   :  { %473 = vmatprep.subr.bf16.mxu0 %v626_v0 }
  0x4d   :  { %458 = vmatpush3.bf16.msra.mxu1 %v502_v11 }
  0x4e   :  { %459 = vmatprep.subr.bf16.mxu1 %v626_v0  ;;  %474 = vmatpush3.bf16.msra.mxu0 %v508_v17 }
  0x4f   :  { %475 = vmatprep.subr.bf16.mxu0 %v626_v0 }
  0x51   :  { %460 = vmatpush3.bf16.msra.mxu1 %v503_v12 }
  0x52   :  { %476 = vmatpush3.bf16.msra.mxu0 %v509_v18 }
  0x53   :  { %477 = vmatprep.subr.bf16.mxu0 %v626_v0 }
  0x56   :  { %478 = vmatpush3.bf16.msra.mxu0 %v510_v27 }
  0x57   :  { %479 = vmatprep.subr.bf16.mxu0 %v626_v0 }
  0x5a   :  { %480 = vmatpush3.bf16.msra.mxu0 %v511_v28 }
  0xfc   :  { %v144_v20 = vpop.f32.mrf.mxu0 }
  0xfd   :  { %v145_v21 = vadd.f32 %v394_v19, %v144_v20 }
  0xfe   :  { %v443_v22 = vpop.f32.mrf.mxu0 }
  0xff   :  { %v150_v23 = vmax.f32 %v145_v21, 0.0 }
 0x100   :  { %v147_v24 = vpop.f32.mrf.mxu0 }
 0x101   :  { %v168_v25 = vpack.c.bf16 %v150_v23, %v150_v23 }
 0x102   :  { %v444_v26 = vpop.f32.mrf.mxu0 }
 0x103   :  { %462 = vmatmul.mubr.bf16.vlgmr.msra.gmra.mxu1 %v168_v25 }
 0x1c3   :  { %v257_v30 = vpop.f32.mrf.mxu1 }
 0x1c4   :  { %v258_v31 = vadd.f32 %v398_v29, %v257_v30 }
 0x1c5   :  { %v463_v32 = vpop.f32.mrf.mxu1 }
 0x1c6   :  { %v263_v33 = vmax.f32 %v258_v31, 0.0 }
 0x1c7   :  { %v260_v34 = vpop.f32.mrf.mxu1 }
 0x1c8   :  { %v281_v35 = vpack.c.bf16 %v263_v33, %v263_v33 }
 0x1c9   :  { %v464_v36 = vpop.f32.mrf.mxu1 }
 0x1ca   :  { %482 = vmatmul.mubr.bf16.vlgmr.msra.gmra.mxu0 %v281_v35 }
 0x28a   :  { %v370_v38 = vpop.f32.mrf.mxu0 }
 0x28b   :  { %v371_v39 = vadd.f32 %v407_v37, %v370_v38 }
 0x28c   :  { %v483_v40 = vpop.f32.mrf.mxu0 }
 0x28d   :  { %376 = vst [vmem:[#allocation10] sm:$0xff] %v371_v39 }
 0x28e   :  { %v373_v41 = vpop.f32.mrf.mxu0 }
 0x28f   :  { %603 = shalt.err (!%p600_p10)
}
 0x290   :  { %386 = dma.vmem_to_hbm [thread:$0]  %s384_s25, 128, %s724_s7, [#allocation4]   ;;  %v484_v42 = vpop.f32.mrf.mxu0 }
 0x291   :  { %618 = dma.done.wait [#allocation4], 128  }
 0x292   :  { %619 = vsyncadd [#allocation4], 4294967168 }
 0x293   :  { %390 = vsyncpa [#allocation3], 1 }
 0x294   :  { %391 = vsyncpa [#allocation6], 1 }
 0x295   :  { %392 = vsyncpa [#allocation9], 1 }
 0x296   :  { %393 = vsyncpa [#allocation4], 1 }

// kernel: generator_forward.1
= control target key start
LH: loop header
LB: loop body
LE: loop exit
PB: predicated region body
PF: predicated region fallthrough
CT: control target
= control target key end

     0   :  { %12 = vsyncpa [#allocation3], 0  ;;  %s717_s0 = inlined_call_operand.vmem [shape: f32[8,32], index: 0, kind: input, shape index: {}]   ;;  %s718_s1 = inlined_call_operand.hbm [shape: bf16[32,128], index: 1, kind: input, shape index: {}]   ;;  %s719_s2 = inlined_call_operand.vmem [shape: f32[1,128], index: 2, kind: input, shape index: {}]   ;;  %s720_s3 = inlined_call_operand.hbm [shape: bf16[128,128], index: 3, kind: input, shape index: {}]   ;;  %s721_s4 = inlined_call_operand.vmem [shape: f32[1,128], index: 4, kind: input, shape index: {}]   ;;  %s722_s5 = inlined_call_operand.hbm [shape: bf16[128,128], index: 5, kind: input, shape index: {}]   ;;  %s723_s6 = inlined_call_operand.hbm [shape: f32[1,128], index: 6, kind: input, shape index: {}]   ;;  %s724_s7 = inlined_call_operand.hbm [shape: f32[8,128], index: 7, kind: output, shape index: {}]  }
   0x1   :  { %13 = vsyncpa [#allocation6], 0 }
   0x2   :  { %14 = vsyncpa [#allocation9], 0 }
   0x3   :  { %15 = vsyncpa [#allocation4], 0  ;;  %s620_s24 = smov [#allocation5]   ;;  %s621_s26 = smov [#allocation2]  }
   0x4   :  { %s37_s25 = sshll.u32 %s620_s24, 4  ;;  %s23_s27 = sshll.u32 %s621_s26, 4  ;;  %s38_s25 = int_to_ptr.vmem [resolvable:$true] %s37_s25  ;;  %s24_s27 = int_to_ptr.vmem [resolvable:$true] %s23_s27 }
   0x5   :  { %s520_s28 = scalar_lea.vmem %s38_s25, 1024  ;;  %p525_p1 = scmp.lt.s32.totalorder %s38_s25, %s38_s25 }
   0x6   :  { %p521_p0 = scmp.ne.s32.totalorder %s38_s25, %s520_s28  ;;  %p526_p2 = scmp.lt.s32.totalorder %s520_s28, %s520_s28 }
   0x8   :  { %p527_p3 = por %p526_p2, %p525_p1 }
   0xa   :  { %p528_p4 = pnand %p527_p3, %p521_p0 }
   0xc   :  { %531 = shalt.err (!%p528_p4)
}
   0xd   :  { %s622_s29 = smov 64   ;;  %s623_s30 = smov 4  }
   0xe   :  { %43 = dma.hbm_to_vmem [thread:$0]  %s720_s3, 1024, %s38_s25, [#allocation6], %s622_s29, %s622_s29, %s623_s30  }
   0xf   :  { %s540_s10 = scalar_lea.vmem %s24_s27, 256  ;;  %p545_p6 = scmp.lt.s32.totalorder %s24_s27, %s24_s27 }
  0x10   :  { %p541_p5 = scmp.ne.s32.totalorder %s24_s27, %s540_s10  ;;  %p546_p7 = scmp.lt.s32.totalorder %s540_s10, %s540_s10 }
  0x12   :  { %p547_p8 = por %p546_p7, %p545_p6 }
  0x14   :  { %p548_p9 = pnand %p547_p8, %p541_p5 }
  0x16   :  { %551 = shalt.err (!%p548_p9)
}
  0x17   :  { %29 = dma.hbm_to_vmem [thread:$0]  %s718_s1, 256, %s24_s27, [#allocation3], %s622_s29, %s622_s29, %s623_s30  }
  0x18   :  { %s624_s13 = smov [#allocation7]   ;;  %s625_s15 = smov [#allocation8]  }
  0x19   :  { %s51_s14 = sshll.u32 %s624_s13, 4  ;;  %s64_s16 = sshll.u32 %s625_s15, 4  ;;  %s52_s14 = int_to_ptr.vmem [resolvable:$true] %s51_s14  ;;  %s65_s16 = int_to_ptr.vmem [resolvable:$true] %s64_s16 }
  0x1a   :  { %s560_s17 = scalar_lea.vmem %s52_s14, 1024  ;;  %p565_p11 = scmp.lt.s32.totalorder %s52_s14, %s52_s14 }
  0x1b   :  { %p561_p10 = scmp.ne.s32.totalorder %s52_s14, %s560_s17  ;;  %p566_p12 = scmp.lt.s32.totalorder %s560_s17, %s560_s17 }
  0x1d   :  { %p567_p13 = por %p566_p12, %p565_p11 }
  0x1f   :  { %p568_p0 = pnand %p567_p13, %p561_p10 }
  0x21   :  { %571 = shalt.err (!%p568_p0)
}
  0x22   :  { %57 = dma.hbm_to_vmem [thread:$0]  %s722_s5, 1024, %s52_s14, [#allocation6], %s622_s29, %s622_s29, %s623_s30  }
  0x23   :  { %s580_s19 = scalar_lea.vmem %s65_s16, 16  ;;  %s584_s1 = scalar_lea.vmem %s65_s16, 32 }
  0x24   :  { %p581_p1 = scmp.ne.s32.totalorder %s65_s16, %s580_s19  ;;  %p585_p2 = scmp.lt.s32.totalorder %s65_s16, %s65_s16 }
  0x25   :  { %p586_p3 = scmp.lt.s32.totalorder %s584_s1, %s580_s19 }
  0x27   :  { %p587_p4 = por %p586_p3, %p585_p2 }
  0x29   :  { %p588_p5 = pnand %p587_p4, %p581_p1 }
  0x2b   :  { %591 = shalt.err (!%p588_p5)
}
  0x2c   :  { %67 = dma.hbm_to_vmem [thread:$0]  %s723_s6, 16, %s65_s16, [#allocation9]  }
  0x2d   :  { %612 = dma.done.wait [#allocation3], 256  }
  0x2e   :  { %613 = vsyncadd [#allocation3], 4294967040 }
  0x2f   :  { %614 = dma.done.wait [#allocation6], 2048  }
  0x30   :  { %615 = vsyncadd [#allocation6], 4294965248 }
  0x31   :  { %616 = dma.done.wait [#allocation9], 16  }
  0x32   :  { %617 = vsyncadd [#allocation9], 4294967280  ;;  %v626_v0 = vmov 0.0   ;;  %vm627_vm0 = vmmov 0   ;;  %v494_v1 = vld [vmem:[#allocation2 + $0x8] sm:$0xff]   ;;  %v495_v2 = vld [vmem:[#allocation2] sm:$0xff]  }
  0x33   :  { %437 = vmatprep.subr.bf16.mxu0 %v626_v0  ;;  %441 = vmatprep.mubr.msk.bf16.mxu0 %vm627_vm0, %v626_v0  ;;  %v81_v3 = vld [vmem:[%s717_s0] sm:$0xff]  ;;  %v496_v4 = vld [vmem:[#allocation5 + $0x38] sm:$0xff]   ;;  %vm106_vm1 = vcmask 261120   ;;  %v498_v7 = vld [vmem:[#allocation5 + $0x28] sm:$0xff]  }
  0x34   :  { %445 = vmatprep.subr.bf16.mxu1 %v626_v0  ;;  %461 = vmatprep.mubr.msk.bf16.mxu1 %vm627_vm0, %v626_v0  ;;  %v87_v5 = vpack.c.bf16 %v81_v3, %v81_v3  ;;  %v497_v6 = vld [vmem:[#allocation5 + $0x30] sm:$0xff]   ;;  %v499_v8 = vld [vmem:[#allocation5 + $0x20] sm:$0xff]   ;;  %v500_v9 = vld [vmem:[#allocation5 + $0x18] sm:$0xff]  }
  0x35   :  { %438 = vmatpush3.bf16.msra.mxu0 %v494_v1  ;;  %446 = vmatpush3.bf16.msra.mxu1 %v496_v4  ;;  %v501_v10 = vld [vmem:[#allocation5 + $0x10] sm:$0xff]   ;;  %v502_v11 = vld [vmem:[#allocation5 + $0x8] sm:$0xff]   ;;  %v503_v12 = vld [vmem:[#allocation5] sm:$0xff]  }
  0x36   :  { %439 = vmatprep.subr.bf16.mxu0 %v626_v0  ;;  %447 = vmatprep.subr.bf16.mxu1 %v626_v0  ;;  %v504_v13 = vld [vmem:[#allocation7 + $0x38] sm:$0xff]   ;;  %v505_v14 = vld [vmem:[#allocation7 + $0x30] sm:$0xff]   ;;  %v506_v15 = vld [vmem:[#allocation7 + $0x28] sm:$0xff]  }
  0x37   :  { %v507_v16 = vld [vmem:[#allocation7 + $0x20] sm:$0xff]   ;;  %v508_v17 = vld [vmem:[#allocation7 + $0x18] sm:$0xff]   ;;  %v509_v18 = vld [vmem:[#allocation7 + $0x10] sm:$0xff]  }
  0x38   :  { %v394_v19 = vld [vmem:[%s719_s2] ss:$0 sm:$0xff]  ;;  %v510_v27 = vld [vmem:[#allocation7 + $0x8] sm:$0xff]   ;;  %v511_v28 = vld [vmem:[#allocation7] sm:$0xff]   ;;  %s628_s2 = smov [#allocation10]  }
  0x39   :  { %440 = vmatpush3.bf16.msra.mxu0 %v495_v2  ;;  %448 = vmatpush3.bf16.msra.mxu1 %v497_v6  ;;  %v398_v29 = vld [vmem:[%s721_s4] ss:$0 sm:$0xff]  ;;  %v407_v37 = vld [vmem:[#allocation8] ss:$0 sm:$0xff]  ;;  %s383_s25 = sshll.u32 %s628_s2, 4  ;;  %s384_s25 = int_to_ptr.vmem [resolvable:$true] %s383_s25 }
  0x3a   :  { %465 = vmatprep.subr.bf16.mxu0 %v626_v0  ;;  %449 = vmatprep.subr.bf16.mxu1 %v626_v0  ;;  %s592_s26 = scalar_lea.vmem %s384_s25, 128  ;;  %p597_p7 = scmp.lt.s32.totalorder %s384_s25, %s384_s25 }
  0x3b   :  { %p593_p6 = scmp.ne.s32.totalorder %s384_s25, %s592_s26  ;;  %p598_p8 = scmp.lt.s32.totalorder %s592_s26, %s592_s26 }
  0x3c   :  { %442 = vmatmul.mubr.msk.bf16.vlgmr.msra.gmra.mxu0 %vm106_vm1, %v87_v5 }
  0x3d   :  { %481 = vmatprep.mubr.msk.bf16.mxu0 %vm627_vm0, %v626_v0  ;;  %450 = vmatpush3.bf16.msra.mxu1 %v498_v7  ;;  %p599_p9 = por %p598_p8, %p597_p7 }
  0x3e   :  { %451 = vmatprep.subr.bf16.mxu1 %v626_v0  ;;  %466 = vmatpush3.bf16.msra.mxu0 %v504_v13 }
  0x3f   :  { %467 = vmatprep.subr.bf16.mxu0 %v626_v0  ;;  %p600_p10 = pnand %p599_p9, %p593_p6 }
  0x41   :  { %452 = vmatpush3.bf16.msra.mxu1 %v499_v8 }
  0x42   :  { %453 = vmatprep.subr.bf16.mxu1 %v626_v0  ;;  %468 = vmatpush3.bf16.msra.mxu0 %v505_v14 }
  0x43   :  { %469 = vmatprep.subr.bf16.mxu0 %v626_v0 }
  0x45   :  { %454 = vmatpush3.bf16.msra.mxu1 %v500_v9 }
  0x46   :  { %455 = vmatprep.subr.bf16.mxu1 %v626_v0  ;;  %470 = vmatpush3.bf16.msra.mxu0 %v506_v15 }
  0x47   :  { %471 = vmatprep.subr.bf16.mxu0 %v626_v0 }
  0x49   :  { %456 = vmatpush3.bf16.msra.mxu1 %v501_v10 }
  0x4a   :  { %457 = vmatprep.subr.bf16.mxu1 %v626_v0  ;;  %472 = vmatpush3.bf16.msra.mxu0 %v507_v16 }
  0x4b   :  { %473 = vmatprep.subr.bf16.mxu0 %v626_v0 }
  0x4d   :  { %458 = vmatpush3.bf16.msra.mxu1 %v502_v11 }
  0x4e   :  { %459 = vmatprep.subr.bf16.mxu1 %v626_v0  ;;  %474 = vmatpush3.bf16.msra.mxu0 %v508_v17 }
  0x4f   :  { %475 = vmatprep.subr.bf16.mxu0 %v626_v0 }
  0x51   :  { %460 = vmatpush3.bf16.msra.mxu1 %v503_v12 }
  0x52   :  { %476 = vmatpush3.bf16.msra.mxu0 %v509_v18 }
  0x53   :  { %477 = vmatprep.subr.bf16.mxu0 %v626_v0 }
  0x56   :  { %478 = vmatpush3.bf16.msra.mxu0 %v510_v27 }
  0x57   :  { %479 = vmatprep.subr.bf16.mxu0 %v626_v0 }
  0x5a   :  { %480 = vmatpush3.bf16.msra.mxu0 %v511_v28 }
  0xfc   :  { %v144_v20 = vpop.f32.mrf.mxu0 }
  0xfd   :  { %v145_v21 = vadd.f32 %v394_v19, %v144_v20 }
  0xfe   :  { %v443_v22 = vpop.f32.mrf.mxu0 }
  0xff   :  { %v150_v23 = vmax.f32 %v145_v21, 0.0 }
 0x100   :  { %v147_v24 = vpop.f32.mrf.mxu0 }
 0x101   :  { %v168_v25 = vpack.c.bf16 %v150_v23, %v150_v23 }
 0x102   :  { %v444_v26 = vpop.f32.mrf.mxu0 }
 0x103   :  { %462 = vmatmul.mubr.bf16.vlgmr.msra.gmra.mxu1 %v168_v25 }
 0x1c3   :  { %v257_v30 = vpop.f32.mrf.mxu1 }
 0x1c4   :  { %v258_v31 = vadd.f32 %v398_v29, %v257_v30 }
 0x1c5   :  { %v463_v32 = vpop.f32.mrf.mxu1 }
 0x1c6   :  { %v263_v33 = vmax.f32 %v258_v31, 0.0 }
 0x1c7   :  { %v260_v34 = vpop.f32.mrf.mxu1 }
 0x1c8   :  { %v281_v35 = vpack.c.bf16 %v263_v33, %v263_v33 }
 0x1c9   :  { %v464_v36 = vpop.f32.mrf.mxu1 }
 0x1ca   :  { %482 = vmatmul.mubr.bf16.vlgmr.msra.gmra.mxu0 %v281_v35 }
 0x28a   :  { %v370_v38 = vpop.f32.mrf.mxu0 }
 0x28b   :  { %v371_v39 = vadd.f32 %v407_v37, %v370_v38 }
 0x28c   :  { %v483_v40 = vpop.f32.mrf.mxu0 }
 0x28d   :  { %376 = vst [vmem:[#allocation10] sm:$0xff] %v371_v39 }
 0x28e   :  { %v373_v41 = vpop.f32.mrf.mxu0 }
 0x28f   :  { %603 = shalt.err (!%p600_p10)
}
 0x290   :  { %386 = dma.vmem_to_hbm [thread:$0]  %s384_s25, 128, %s724_s7, [#allocation4]   ;;  %v484_v42 = vpop.f32.mrf.mxu0 }
 0x291   :  { %618 = dma.done.wait [#allocation4], 128  }
 0x292   :  { %619 = vsyncadd [#allocation4], 4294967168 }
 0x293   :  { %390 = vsyncpa [#allocation3], 1 }
 0x294   :  { %391 = vsyncpa [#allocation6], 1 }
 0x295   :  { %392 = vsyncpa [#allocation9], 1 }
 0x296   :  { %393 = vsyncpa [#allocation4], 1 }

</bundles_post_ra>
